<compile_context>
chip_gen: v6e
topology: v6e:2x2x1
jax: 0.10.0
libtpu: 0.0.40
codegen_flags: <defaults>
</compile_context>

<pallas_src>
import functools

import jax
import jax.numpy as jnp
import numpy as np
from jax.experimental import pallas as pl
from jax.experimental.pallas import tpu as pltpu


def _gather_kernel(tok_ref, w_hbm, o_ref, sem, *, n_sem):
    # tok_ref : (N_pad,) int32 in SMEM (scalar prefetch)
    # w_hbm   : (V, E) weight ref left in HBM (memory_space=pl.ANY)
    # o_ref   : (tile, E) output block in VMEM
    # sem     : (n_sem,) DMA semaphores -- ring buffer of in-flight copies
    tile = o_ref.shape[0]
    base = pl.program_id(0) * tile

    def row_copy(row, j):
        # One (1, E) row: HBM weight row `row` -> row j of the VMEM out block.
        return pltpu.make_async_copy(
            w_hbm.at[pl.ds(row, 1), :],
            o_ref.at[pl.ds(j, 1), :],
            sem.at[j % n_sem],
        )

    # Prologue: fill the pipeline with n_sem in-flight row DMAs.
    @pl.loop(0, n_sem)
    def _(j):
        row_copy(tok_ref[base + j], j).start()

    # Steady state: retire copy j, immediately issue copy j + n_sem on the
    # same semaphore slot.  The next token is read BEFORE the wait so the
    # SMEM scalar load is not serialized behind the DMA wait.
    @pl.loop(0, tile - n_sem)
    def _(j):
        row_next = tok_ref[base + j + n_sem]
        row_copy(0, j).wait()          # wait needs only the sem + byte count
        row_copy(row_next, j + n_sem).start()

    # Epilogue: drain the last n_sem copies before the block is written back.
    @pl.loop(tile - n_sem, tile)
    def _(j):
        row_copy(0, j).wait()


def _round_up(x, m):
    return ((x + m - 1) // m) * m


@functools.partial(jax.jit, static_argnames=("tok_tile", "n_sem"))
def downstream_embed(token, weight, *, tok_tile=1024, n_sem=16):
    """token: int (B, S); weight: float32 (V, E) -> (B, S, E)."""
    B, S = token.shape
    V, E = weight.shape
    N = B * S
    itemsize = jnp.dtype(weight.dtype).itemsize

    # Token tile: multiple of 8, capped so the double-buffered (tile, E)
    # output block stays under ~8 MiB (fits every generation's scoped-VMEM
    # default), and clamped to the (8-aligned) problem size so toy shapes
    # don't over-pad.
    vmem_budget = 8 * 1024 * 1024
    max_tile = max(8, (vmem_budget // (2 * E * itemsize)) // 8 * 8)
    tile = min(tok_tile, max_tile, _round_up(N, 8))
    tile = max(8, (tile // 8) * 8)
    n_flight = max(1, min(n_sem, tile))
    N_pad = _round_up(N, tile)

    # Padded slots gather row 0; those rows are sliced off below so they
    # never leak into the result (at most tile-1 wasted row DMAs, last tile).
    tok_flat = jnp.zeros((N_pad,), jnp.int32).at[:N].set(
        token.reshape(-1).astype(jnp.int32)
    )

    out = pl.pallas_call(
        functools.partial(_gather_kernel, n_sem=n_flight),
        out_shape=jax.ShapeDtypeStruct((N_pad, E), weight.dtype),
        grid_spec=pltpu.PrefetchScalarGridSpec(
            num_scalar_prefetch=1,
            grid=(N_pad // tile,),
            in_specs=[
                pl.BlockSpec(memory_space=pl.ANY),   # weight stays in HBM
            ],
            out_specs=pl.BlockSpec((tile, E), lambda i, tok: (i, 0)),
            scratch_shapes=[pltpu.SemaphoreType.DMA((n_flight,))],
        ),
        compiler_params=pltpu.CompilerParams(
            dimension_semantics=("parallel",),
        ),
        cost_estimate=pl.CostEstimate(
            flops=0,
            transcendentals=0,
            bytes_accessed=2 * N * E * itemsize + N * 4,
        ),
    )(tok_flat, weight)

    return out[:N].reshape(B, S, E)


if __name__ == "__main__":
    # Small shapes consistent with the module.
    num_loc = 10          # vocab = num_loc + 1 (last row is the padding row)
    embed_size = 32
    B, S = 2, 8

    key = jax.random.PRNGKey(0)
    k_w, k_t = jax.random.split(key)

    # Deterministic parameter init mirroring the PyTorch uniform_ init.
    V = num_loc + 1
    weight = jax.random.uniform(
        k_w, (V, embed_size), jnp.float32,
        minval=-0.5 / embed_size, maxval=0.5 / embed_size,
    )

    # Tokens in [0, num_loc] (num_loc == padding index is a legal token too).
    token = jax.random.randint(k_t, (B, S), 0, V, dtype=jnp.int32)

    out = downstream_embed(token, weight)
    out = jax.block_until_ready(out)

    # Reference: plain gather. The kernel is a pure DMA copy, so bit-exact.
    ref = weight[token]
    np.testing.assert_allclose(np.asarray(out), np.asarray(ref), rtol=0, atol=0)

    print("KERNEL_OK")
</pallas_src>

<mosaic_0001>
module attributes {stable_mosaic.version = 11 : i64} {
  func.func @_gather_kernel(%arg0: i32, %arg1: memref<16xi32, #tpu.memory_space<smem>>, %arg2: memref<11x32xf32, #tpu.memory_space<any>>, %arg3: memref<16x32xf32, #tpu.memory_space<vmem>>, %arg4: memref<16x!tpu.dma_semaphore, #tpu.memory_space<semaphore_mem>>) attributes {dimension_semantics = [#tpu.dimension_semantics<parallel>], iteration_bounds = array<i64: 1>, scalar_prefetch = 1 : i64, scratch_operands = 1 : i64, tpu.core_type = #tpu.core_type<tc>, window_params = [{}, {transform_indices = @transform_1, window_bounds = array<i64: 16, 32>}]} {
    %c16_i32 = arith.constant 16 : i32
    %0 = arith.muli %arg0, %c16_i32 : i32
    %c0_i32 = arith.constant 0 : i32
    %c16_i32_0 = arith.constant 16 : i32
    %1 = arith.addi %c0_i32, %c16_i32_0 : i32
    %c1_i32 = arith.constant 1 : i32
    scf.for %arg5 = %c0_i32 to %1 step %c1_i32  : i32 {
      %c1_i32_10 = arith.constant 1 : i32
      %4 = arith.muli %arg5, %c1_i32_10 : i32
      %c0_i32_11 = arith.constant 0 : i32
      %5 = arith.addi %c0_i32_11, %4 : i32
      %6 = arith.addi %0, %5 : i32
      %7 = arith.index_cast %6 : i32 to index
      %8 = memref.load %arg1[%7] : memref<16xi32, #tpu.memory_space<smem>>
      %c16_i32_12 = arith.constant 16 : i32
      %c0_i32_13 = arith.constant 0 : i32
      %9 = arith.cmpi eq, %c16_i32_12, %c0_i32_13 : i32
      %c1_i32_14 = arith.constant 1 : i32
      %10 = arith.select %9, %c1_i32_14, %c16_i32_12 : i32
      %11 = arith.remsi %5, %10 : i32
      %c0_i32_15 = arith.constant 0 : i32
      %12 = arith.cmpi ne, %11, %c0_i32_15 : i32
      %c0_i32_16 = arith.constant 0 : i32
      %13 = arith.cmpi slt, %11, %c0_i32_16 : i32
      %c0_i32_17 = arith.constant 0 : i32
      %14 = arith.cmpi slt, %10, %c0_i32_17 : i32
      %15 = arith.xori %13, %14 : i1
      %16 = arith.andi %15, %12 : i1
      %17 = arith.addi %11, %10 : i32
      %18 = arith.select %16, %17, %11 : i32
      %c0_i32_18 = arith.constant 0 : i32
      %19 = tpu.memref_slice %arg2[%8, %c0_i32_18] : memref<11x32xf32, #tpu.memory_space<any>> -> memref<1x32xf32, #tpu.memory_space<any>>
      %c0_i32_19 = arith.constant 0 : i32
      %20 = tpu.memref_slice %arg3[%5, %c0_i32_19] : memref<16x32xf32, #tpu.memory_space<vmem>> -> memref<1x32xf32, #tpu.memory_space<vmem>>
      %21 = tpu.memref_slice %arg4[%18] : memref<16x!tpu.dma_semaphore, #tpu.memory_space<semaphore_mem>> -> memref<1x!tpu.dma_semaphore, #tpu.memory_space<semaphore_mem>>
      %22 = tpu.memref_squeeze %21 : memref<1x!tpu.dma_semaphore, #tpu.memory_space<semaphore_mem>> -> memref<!tpu.dma_semaphore, #tpu.memory_space<semaphore_mem>>
      tpu.enqueue_dma source(%19 : memref<1x32xf32, #tpu.memory_space<any>>) target(%20 : memref<1x32xf32, #tpu.memory_space<vmem>>) target_semaphore(%22 : memref<!tpu.dma_semaphore, #tpu.memory_space<semaphore_mem>>)
    }
    %c16_i32_1 = arith.constant 16 : i32
    %c0_i32_2 = arith.constant 0 : i32
    %c0_i32_3 = arith.constant 0 : i32
    %2 = arith.addi %c0_i32_2, %c0_i32_3 : i32
    %c1_i32_4 = arith.constant 1 : i32
    scf.for %arg5 = %c0_i32_2 to %2 step %c1_i32_4  : i32 {
      %c1_i32_10 = arith.constant 1 : i32
      %4 = arith.muli %arg5, %c1_i32_10 : i32
      %c0_i32_11 = arith.constant 0 : i32
      %5 = arith.addi %c0_i32_11, %4 : i32
      %6 = arith.addi %0, %5 : i32
      %c16_i32_12 = arith.constant 16 : i32
      %7 = arith.addi %6, %c16_i32_12 : i32
      %8 = arith.index_cast %7 : i32 to index
      %9 = memref.load %arg1[%8] : memref<16xi32, #tpu.memory_space<smem>>
      %c16_i32_13 = arith.constant 16 : i32
      %c0_i32_14 = arith.constant 0 : i32
      %10 = arith.cmpi eq, %c16_i32_13, %c0_i32_14 : i32
      %c1_i32_15 = arith.constant 1 : i32
      %11 = arith.select %10, %c1_i32_15, %c16_i32_13 : i32
      %12 = arith.remsi %5, %11 : i32
      %c0_i32_16 = arith.constant 0 : i32
      %13 = arith.cmpi ne, %12, %c0_i32_16 : i32
      %c0_i32_17 = arith.constant 0 : i32
      %14 = arith.cmpi slt, %12, %c0_i32_17 : i32
      %c0_i32_18 = arith.constant 0 : i32
      %15 = arith.cmpi slt, %11, %c0_i32_18 : i32
      %16 = arith.xori %14, %15 : i1
      %17 = arith.andi %16, %13 : i1
      %18 = arith.addi %12, %11 : i32
      %19 = arith.select %17, %18, %12 : i32
      %c0_i32_19 = arith.constant 0 : i32
      %c0_i32_20 = arith.constant 0 : i32
      %20 = tpu.memref_slice %arg2[%c0_i32_19, %c0_i32_20] : memref<11x32xf32, #tpu.memory_space<any>> -> memref<1x32xf32, #tpu.memory_space<any>>
      %c0_i32_21 = arith.constant 0 : i32
      %21 = tpu.memref_slice %arg3[%5, %c0_i32_21] : memref<16x32xf32, #tpu.memory_space<vmem>> -> memref<1x32xf32, #tpu.memory_space<vmem>>
      %22 = tpu.memref_slice %arg4[%19] : memref<16x!tpu.dma_semaphore, #tpu.memory_space<semaphore_mem>> -> memref<1x!tpu.dma_semaphore, #tpu.memory_space<semaphore_mem>>
      %23 = tpu.memref_squeeze %22 : memref<1x!tpu.dma_semaphore, #tpu.memory_space<semaphore_mem>> -> memref<!tpu.dma_semaphore, #tpu.memory_space<semaphore_mem>>
      tpu.wait_dma2 semaphore(%23 : memref<!tpu.dma_semaphore, #tpu.memory_space<semaphore_mem>>) src(%20 : memref<1x32xf32, #tpu.memory_space<any>>) dst(%21 : memref<1x32xf32, #tpu.memory_space<vmem>>)
      %c16_i32_22 = arith.constant 16 : i32
      %24 = arith.addi %5, %c16_i32_22 : i32
      %c16_i32_23 = arith.constant 16 : i32
      %c0_i32_24 = arith.constant 0 : i32
      %25 = arith.cmpi eq, %c16_i32_23, %c0_i32_24 : i32
      %c1_i32_25 = arith.constant 1 : i32
      %26 = arith.select %25, %c1_i32_25, %c16_i32_23 : i32
      %27 = arith.remsi %24, %26 : i32
      %c0_i32_26 = arith.constant 0 : i32
      %28 = arith.cmpi ne, %27, %c0_i32_26 : i32
      %c0_i32_27 = arith.constant 0 : i32
      %29 = arith.cmpi slt, %27, %c0_i32_27 : i32
      %c0_i32_28 = arith.constant 0 : i32
      %30 = arith.cmpi slt, %26, %c0_i32_28 : i32
      %31 = arith.xori %29, %30 : i1
      %32 = arith.andi %31, %28 : i1
      %33 = arith.addi %27, %26 : i32
      %34 = arith.select %32, %33, %27 : i32
      %c0_i32_29 = arith.constant 0 : i32
      %35 = tpu.memref_slice %arg2[%9, %c0_i32_29] : memref<11x32xf32, #tpu.memory_space<any>> -> memref<1x32xf32, #tpu.memory_space<any>>
      %c0_i32_30 = arith.constant 0 : i32
      %36 = tpu.memref_slice %arg3[%24, %c0_i32_30] : memref<16x32xf32, #tpu.memory_space<vmem>> -> memref<1x32xf32, #tpu.memory_space<vmem>>
      %37 = tpu.memref_slice %arg4[%34] : memref<16x!tpu.dma_semaphore, #tpu.memory_space<semaphore_mem>> -> memref<1x!tpu.dma_semaphore, #tpu.memory_space<semaphore_mem>>
      %38 = tpu.memref_squeeze %37 : memref<1x!tpu.dma_semaphore, #tpu.memory_space<semaphore_mem>> -> memref<!tpu.dma_semaphore, #tpu.memory_space<semaphore_mem>>
      tpu.enqueue_dma source(%35 : memref<1x32xf32, #tpu.memory_space<any>>) target(%36 : memref<1x32xf32, #tpu.memory_space<vmem>>) target_semaphore(%38 : memref<!tpu.dma_semaphore, #tpu.memory_space<semaphore_mem>>)
    }
    %c0_i32_5 = arith.constant 0 : i32
    %c0_i32_6 = arith.constant 0 : i32
    %c16_i32_7 = arith.constant 16 : i32
    %3 = arith.addi %c0_i32_6, %c16_i32_7 : i32
    %c1_i32_8 = arith.constant 1 : i32
    scf.for %arg5 = %c0_i32_6 to %3 step %c1_i32_8  : i32 {
      %c1_i32_10 = arith.constant 1 : i32
      %4 = arith.muli %arg5, %c1_i32_10 : i32
      %c0_i32_11 = arith.constant 0 : i32
      %5 = arith.addi %c0_i32_11, %4 : i32
      %c16_i32_12 = arith.constant 16 : i32
      %c0_i32_13 = arith.constant 0 : i32
      %6 = arith.cmpi eq, %c16_i32_12, %c0_i32_13 : i32
      %c1_i32_14 = arith.constant 1 : i32
      %7 = arith.select %6, %c1_i32_14, %c16_i32_12 : i32
      %8 = arith.remsi %5, %7 : i32
      %c0_i32_15 = arith.constant 0 : i32
      %9 = arith.cmpi ne, %8, %c0_i32_15 : i32
      %c0_i32_16 = arith.constant 0 : i32
      %10 = arith.cmpi slt, %8, %c0_i32_16 : i32
      %c0_i32_17 = arith.constant 0 : i32
      %11 = arith.cmpi slt, %7, %c0_i32_17 : i32
      %12 = arith.xori %10, %11 : i1
      %13 = arith.andi %12, %9 : i1
      %14 = arith.addi %8, %7 : i32
      %15 = arith.select %13, %14, %8 : i32
      %c0_i32_18 = arith.constant 0 : i32
      %c0_i32_19 = arith.constant 0 : i32
      %16 = tpu.memref_slice %arg2[%c0_i32_18, %c0_i32_19] : memref<11x32xf32, #tpu.memory_space<any>> -> memref<1x32xf32, #tpu.memory_space<any>>
      %c0_i32_20 = arith.constant 0 : i32
      %17 = tpu.memref_slice %arg3[%5, %c0_i32_20] : memref<16x32xf32, #tpu.memory_space<vmem>> -> memref<1x32xf32, #tpu.memory_space<vmem>>
      %18 = tpu.memref_slice %arg4[%15] : memref<16x!tpu.dma_semaphore, #tpu.memory_space<semaphore_mem>> -> memref<1x!tpu.dma_semaphore, #tpu.memory_space<semaphore_mem>>
      %19 = tpu.memref_squeeze %18 : memref<1x!tpu.dma_semaphore, #tpu.memory_space<semaphore_mem>> -> memref<!tpu.dma_semaphore, #tpu.memory_space<semaphore_mem>>
      tpu.wait_dma2 semaphore(%19 : memref<!tpu.dma_semaphore, #tpu.memory_space<semaphore_mem>>) src(%16 : memref<1x32xf32, #tpu.memory_space<any>>) dst(%17 : memref<1x32xf32, #tpu.memory_space<vmem>>)
    }
    %c16_i32_9 = arith.constant 16 : i32
    return
  }
  func.func @transform_1(%arg0: i32, %arg1: memref<16xi32, #tpu.memory_space<smem>>) -> (i32, i32) {
    %c0_i32 = arith.constant 0 : i32
    %c0_i32_0 = arith.constant 0 : i32
    return %arg0, %c0_i32 : i32, i32
  }
}

</mosaic_0001>

<bundles_post_ra>
// kernel: downstream_embed.1
= control target key start
LH: loop header
LB: loop body
LE: loop exit
PB: predicated region body
PF: predicated region fallthrough
CT: control target
= control target key end

     0   :  { %s394_s0 = inlined_call_operand.vmem [shape: s32[16], index: 0, kind: input, shape index: {}]   ;;  %s395_s1 = inlined_call_operand.hbm [shape: f32[11,32], index: 1, kind: input, shape index: {}]   ;;  %s396_s2 = inlined_call_operand.hbm [shape: f32[16,32], index: 2, kind: output, shape index: {}]  }
   0x1   :  { %s7_s11 = sshll.u32 %s394_s0, 4  ;;  %s8_s11 = int_to_ptr.vmem [resolvable:$true] %s7_s11 }
   0x2   :  { %s257_s12 = scalar_lea.vmem %s8_s11, 16  ;;  %p262_p1 = scmp.lt.s32.totalorder %s8_s11, %s8_s11 }
   0x3   :  { %p258_p0 = scmp.ne.s32.totalorder %s8_s11, %s257_s12  ;;  %p263_p2 = scmp.lt.s32.totalorder %s257_s12, %s257_s12 }
   0x5   :  { %p264_p3 = por %p263_p2, %p262_p1 }
   0x7   :  { %p265_p4 = pnand %p264_p3, %p258_p0 }
   0x9   :  { %268 = shalt.err (!%p265_p4)  }
   0xa   :  { %s333_s13 = smov [#allocation4]  }
   0xb   :  { %10 = dma.vmem_to_smem %s8_s11, 16, %s333_s13, [#allocation3] }
   0xc   :  { %319 = dma.done.wait [#allocation3], 16 }
   0xd   :  { %320 = vsyncadd [#allocation3], 4294967280 }
   0xe   :  { %12 = sfence }
   0xf   :  { %13 = vsyncpa [#allocation6], 0  ;;  %s355_s14 = smov 0  }
  0x10 LB: > { %s22_s0 = sld [smem:[#allocation4 + %s327_s14]]  ;;  %p23_p5 = scmp.lt.s32.totalorder %s327_s14, 0  ;;  %s327_s14 = sphi %s355_s14, %s20_s14  }
  0x11   : > { %s24_s15 = ssub.s32 0, %s327_s14  ;;  %s37_s19 = scalar_lea.vmem [#allocation5], %s327_s14 }
  0x12   : > { %s214_s16 = smin.u32 %s327_s14, %s24_s15  ;;  %s46_s20 = sshll.u32 %s37_s19, 4  ;;  %s47_s20 = int_to_ptr.vmem [resolvable:$true] %s46_s20 }
  0x13   : > { %s26_s17 = sand.u32 15, %s214_s16   ;;  %s271_s30 = scalar_lea.hbm %s395_s1, 256 }
  0x14   : > { %s27_s18 = ssub.s32 0, %s26_s17 }
  0x15   : > { %s398_s18 = smov (!%p23_p5, %s27_s18), %s26_s17 }
  0x16   : > { %s217_s21 = sshll.u32 %s22_s0, 4  ;;  %p216_p6 = scmp.lt.s32.totalorder %s398_s18, 0 }
  0x17   : > { %s33_s22 = sadd.s32 16, %s398_s18  ;;  %s36_s25 = scalar_lea.hbm %s395_s1, %s217_s21 }
  0x18   : > { %s400_s22 = smov (!%p216_p6, %s33_s22), %s398_s18  ;;  %s269_s27 = scalar_lea.hbm %s36_s25, 16 }
  0x19   : > { %s38_s26 = scalar_lea.sflag [#allocation2], %s400_s22  ;;  %p270_p7 = scmp.ne.s32.totalorder %s36_s25, %s269_s27 }
  0x1a   : > { %p272_p8 = scmp.lt.s32.totalorder %s36_s25, %s395_s1  ;;  %p273_p9 = scmp.lt.s32.totalorder %s271_s30, %s269_s27 }
  0x1c   : > { %p274_p10 = por %p273_p9, %p272_p8 }
  0x1e   : > { %p275_p11 = pnand %p274_p10, %p270_p7 }
  0x20   : > { %278 = shalt.err (!%p275_p11)  }
  0x21   : > { %s279_s5 = scalar_lea.vmem %s47_s20, 16  ;;  %s334_s6 = smov [#allocation5]  }
  0x22   : > { %p280_p12 = scmp.ne.s32.totalorder %s47_s20, %s279_s5  ;;  %s281_s7 = sshll.u32 %s334_s6, 4  ;;  %s374_s7 = int_to_ptr.vmem [resolvable:$false] %s281_s7 }
  0x23   : > { %s377_s8 = scalar_lea.vmem %s374_s7, 256  ;;  %p284_p13 = scmp.lt.s32.totalorder %s47_s20, %s374_s7 }
  0x24   : > { %p285_p0 = scmp.lt.s32.totalorder %s377_s8, %s279_s5 }
  0x26   : > { %p286_p1 = por %p285_p0, %p284_p13 }
  0x28   : > { %p287_p2 = pnand %p286_p1, %p280_p12 }
  0x2a   : > { %290 = shalt.err (!%p287_p2)  }
  0x2b   : > { %49 = dma.hbm_to_vmem [thread:$0]  %s36_s25, 16, %s47_s20, %s38_s26 }
  0x2c   : > { %s20_s14 = sadd.s32 1, %s327_s14  }
  0x2d   : > { %p17_p3 = scmp.ge.s32.totalorder %s20_s14, 16  }
  0x2e   :  { %s329_s9 = smov (%p17_p3), 0  }
  0x2f   :  { %19 = sbr.rel (!%p17_p3) target bundleno = 16 (0x10), region = 57 }
  0x34 LB: > { %p56_p4 = scmp.lt.s32.totalorder %s331_s9, 0  ;;  %s57_s10 = ssub.s32 0, %s331_s9  ;;  %s331_s9 = sphi %s329_s9, %s55_s9  }
  0x35   : > { %s218_s11 = smin.u32 %s331_s9, %s57_s10 }
  0x36   : > { %s59_s12 = sand.u32 15, %s218_s11  }
  0x37   : > { %s60_s13 = ssub.s32 0, %s59_s12 }
  0x38   : > { %s402_s13 = smov (!%p56_p4, %s60_s13), %s59_s12 }
  0x39   : > { %p220_p5 = scmp.lt.s32.totalorder %s402_s13, 0  ;;  %s66_s0 = sadd.s32 16, %s402_s13 }
  0x3b   : > { %s404_s0 = smov (!%p220_p5, %s66_s0), %s402_s13 }
  0x3c   : > { %s68_s15 = scalar_lea.sflag [#allocation2], %s404_s0 }
  0x3d   : > { %321 = dma.done.wait %s68_s15, 16 }
  0x3e   : > { %322 = vsyncadd %s68_s15, 4294967280  ;;  %s55_s9 = sadd.s32 1, %s331_s9  }
  0x3f   : > { %p52_p6 = scmp.ge.s32.totalorder %s55_s9, 16  }
  0x40   :  { %p292_p7 = scmp.ne.s32.totalorder (%p52_p6), %s374_s7, %s377_s8  ;;  %p296_p8 = scmp.lt.s32.totalorder (%p52_p6), %s374_s7, %s374_s7 }
  0x41   :  { %54 = sbr.rel (!%p52_p6) target bundleno = 52 (0x34), region = 68  ;;  %p297_p9 = scmp.lt.s32.totalorder (%p52_p6), %s377_s8, %s377_s8 }
  0x43   :  { %p298_p10 = por (%p52_p6), %p297_p9, %p296_p8 }
  0x45   :  { %p299_p11 = pnand (%p52_p6), %p298_p10, %p292_p7 }
  0x47   :  { %302 = shalt.err (!%p299_p11)
}
  0x48   :  { %s335_s1 = smov 128   ;;  %s336_s14 = smov 8  }
  0x49   :  { %83 = dma.vmem_to_hbm [thread:$0]  %s374_s7, 256, %s396_s2, [#allocation6], %s335_s1, %s335_s1, %s336_s14  }
  0x4a   :  { %323 = dma.done.wait [#allocation6], 256  }
  0x4b   :  { %324 = vsyncadd [#allocation6], 4294967040 }
  0x4c   :  { %87 = vsyncpa [#allocation6], 1 }
  0x4d   :  { %88 = vsyncmov [#allocation2] }
  0x50   :  { %s89_s18 = vpop.sfrf %88 }
  0x51   :  { %p221_p12 = scmp.ne.s32.totalorder %s89_s18, 0 }
  0x53   :  { %93 = shalt.err (%p221_p12)  }
  0x54   :  { %95 = vsyncmov [#allocation2 + $0x1] }
  0x57   :  { %s96_s19 = vpop.sfrf %95 }
  0x58   :  { %p222_p13 = scmp.ne.s32.totalorder %s96_s19, 0 }
  0x5a   :  { %100 = shalt.err (%p222_p13)  }
  0x5b   :  { %102 = vsyncmov [#allocation2 + $0x2] }
  0x5e   :  { %s103_s20 = vpop.sfrf %102 }
  0x5f   :  { %p223_p0 = scmp.ne.s32.totalorder %s103_s20, 0 }
  0x61   :  { %107 = shalt.err (%p223_p0)  }
  0x62   :  { %109 = vsyncmov [#allocation2 + $0x3] }
  0x65   :  { %s110_s21 = vpop.sfrf %109 }
  0x66   :  { %p224_p1 = scmp.ne.s32.totalorder %s110_s21, 0 }
  0x68   :  { %114 = shalt.err (%p224_p1)  }
  0x69   :  { %116 = vsyncmov [#allocation2 + $0x4] }
  0x6c   :  { %s117_s2 = vpop.sfrf %116 }
  0x6d   :  { %p225_p2 = scmp.ne.s32.totalorder %s117_s2, 0 }
  0x6f   :  { %121 = shalt.err (%p225_p2)  }
  0x70   :  { %123 = vsyncmov [#allocation2 + $0x5] }
  0x73   :  { %s124_s22 = vpop.sfrf %123 }
  0x74   :  { %p226_p3 = scmp.ne.s32.totalorder %s124_s22, 0 }
  0x76   :  { %128 = shalt.err (%p226_p3)  }
  0x77   :  { %130 = vsyncmov [#allocation2 + $0x6] }
  0x7a   :  { %s131_s23 = vpop.sfrf %130 }
  0x7b   :  { %p227_p4 = scmp.ne.s32.totalorder %s131_s23, 0 }
  0x7d   :  { %135 = shalt.err (%p227_p4)  }
  0x7e   :  { %137 = vsyncmov [#allocation2 + $0x7] }
  0x81   :  { %s138_s24 = vpop.sfrf %137 }
  0x82   :  { %p228_p5 = scmp.ne.s32.totalorder %s138_s24, 0 }
  0x84   :  { %142 = shalt.err (%p228_p5)  }
  0x85   :  { %144 = vsyncmov [#allocation2 + $0x8] }
  0x88   :  { %s145_s25 = vpop.sfrf %144 }
  0x89   :  { %p229_p6 = scmp.ne.s32.totalorder %s145_s25, 0 }
  0x8b   :  { %149 = shalt.err (%p229_p6)  }
  0x8c   :  { %151 = vsyncmov [#allocation2 + $0x9] }
  0x8f   :  { %s152_s26 = vpop.sfrf %151 }
  0x90   :  { %p230_p7 = scmp.ne.s32.totalorder %s152_s26, 0 }
  0x92   :  { %156 = shalt.err (%p230_p7)  }
  0x93   :  { %158 = vsyncmov [#allocation2 + $0xa] }
  0x96   :  { %s159_s27 = vpop.sfrf %158 }
  0x97   :  { %p231_p8 = scmp.ne.s32.totalorder %s159_s27, 0 }
  0x99   :  { %163 = shalt.err (%p231_p8)  }
  0x9a   :  { %165 = vsyncmov [#allocation2 + $0xb] }
  0x9d   :  { %s166_s28 = vpop.sfrf %165 }
  0x9e   :  { %p232_p9 = scmp.ne.s32.totalorder %s166_s28, 0 }
  0xa0   :  { %170 = shalt.err (%p232_p9)  }
  0xa1   :  { %172 = vsyncmov [#allocation2 + $0xc] }
  0xa4   :  { %s173_s29 = vpop.sfrf %172 }
  0xa5   :  { %p233_p10 = scmp.ne.s32.totalorder %s173_s29, 0 }
  0xa7   :  { %177 = shalt.err (%p233_p10)  }
  0xa8   :  { %179 = vsyncmov [#allocation2 + $0xd] }
  0xab   :  { %s180_s30 = vpop.sfrf %179 }
  0xac   :  { %p234_p11 = scmp.ne.s32.totalorder %s180_s30, 0 }
  0xae   :  { %184 = shalt.err (%p234_p11)  }
  0xaf   :  { %186 = vsyncmov [#allocation2 + $0xe] }
  0xb2   :  { %s187_s3 = vpop.sfrf %186 }
  0xb3   :  { %p235_p12 = scmp.ne.s32.totalorder %s187_s3, 0 }
  0xb5   :  { %191 = shalt.err (%p235_p12)  }
  0xb6   :  { %193 = vsyncmov [#allocation2 + $0xf] }
  0xb9   :  { %s194_s4 = vpop.sfrf %193 }
  0xba   :  { %p236_p13 = scmp.ne.s32.totalorder %s194_s4, 0 }
  0xbc   :  { %198 = shalt.err (%p236_p13)  }

</bundles_post_ra>
